<compile_context>
chip_gen: v6e
topology: v6e:2x2x1
jax: 0.10.0
libtpu: 0.0.40
codegen_flags: <defaults>
</compile_context>

<pallas_src>
import jax
import jax.numpy as jnp
from jax.experimental import pallas as pl
from jax.experimental.pallas import tpu as pltpu

STATE_DIM = 4     # CartPole-v1 observation dim
ACTION_DIM = 2    # CartPole-v1 action dim
HIDDEN = 128
LANE = 128        # TPU lane width; batch tiles are lane-aligned


def _round_up(n, m):
    return ((n + m - 1) // m) * m


def _num_tensorcores():
    """Best-effort TensorCore count of the local device (2 on v7x megacore, else 1).
    Only affects tile balance, never correctness."""
    try:
        return min(2, max(1, int(getattr(jax.devices()[0], "num_cores", 1))))
    except Exception:
        return 1


def dqn_kernel(x_ref, w1t_ref, b1_ref, w2t_ref, b2_ref, w3t_ref, b3_ref, out_ref):
    x = x_ref[...]            # (4, TB)   f32, batch on lanes
    w1t = w1t_ref[...]        # (128, 4)  f32, PyTorch (out, in) layout

    # Layer 1 on the VPU: K=4 is too shallow for a useful MXU pass.  Each term is a
    # rank-1 outer product; x[k:k+1, :] is a stride-0 sublane broadcast in this layout.
    acc = w1t[:, 0:1] * x[0:1, :]
    for k in range(1, STATE_DIM):
        acc = acc + w1t[:, k:k + 1] * x[k:k + 1, :]
    h1 = jnp.maximum(acc + b1_ref[...], 0.0)                       # (128, TB) f32

    # Layer 2: bf16 single-pass MXU matmul, f32 accumulation; N = TB is lane-dense.
    h2 = jnp.dot(w2t_ref[...], h1.astype(jnp.bfloat16),
                 preferred_element_type=jnp.float32)
    h2 = jnp.maximum(h2 + b2_ref[...], 0.0)                        # (128, TB) f32

    # Layer 3: (2,128) x (128,TB) -> (2, TB) Q-values; output stays lane-dense.
    q = jnp.dot(w3t_ref[...], h2.astype(jnp.bfloat16),
                preferred_element_type=jnp.float32)
    out_ref[...] = (q + b3_ref[...]).astype(out_ref.dtype)


def dqn_forward(x, params, tb_max=4096):
    """x: (B, STATE_DIM) float32.  Returns (B, ACTION_DIM) float32 Q-values."""
    w1t, b1 = params["w1t"], params["b1"]
    w2t, b2 = params["w2t"], params["b2"]
    w3t, b3 = params["w3t"], params["b3"]

    B = x.shape[0]
    xT = x.T                                            # (STATE_DIM, B): layout plumbing only

    n_cores = _num_tensorcores()
    # Balanced, lane-aligned batch tiles: 1 tile on v5e/v6e, 2 equal tiles on v7x.
    TB = min(tb_max, _round_up(pl.cdiv(B, n_cores), LANE))
    n_tiles = pl.cdiv(B, TB)                            # partial last block masked by Pallas

    # Weights/biases: full array, constant block index -> DMA'd once, VMEM-resident.
    resident = lambda a: pl.BlockSpec(a.shape, lambda i: (0,) * a.ndim)

    qT = pl.pallas_call(
        dqn_kernel,
        out_shape=jax.ShapeDtypeStruct((ACTION_DIM, B), jnp.float32),
        grid=(n_tiles,),
        in_specs=[
            pl.BlockSpec((STATE_DIM, TB), lambda i: (0, i)),   # x: batch tiled on lanes
            resident(w1t), resident(b1),
            resident(w2t), resident(b2),
            resident(w3t), resident(b3),
        ],
        out_specs=pl.BlockSpec((ACTION_DIM, TB), lambda i: (0, i)),
        compiler_params=pltpu.CompilerParams(
            dimension_semantics=("parallel",),          # megacore-shard the batch (v7x)
            vmem_limit_bytes=32 * 1024 * 1024,          # kernel uses only a few MiB
        ),
    )(xT, w1t, b1, w2t, b2, w3t, b3)

    return qT.T                                         # (B, ACTION_DIM), module semantics


def init_params(key):
    """PyTorch nn.Linear default init (uniform +/- 1/sqrt(fan_in)).
    Weights stored in PyTorch's native (out, in) layout (i.e. pre-transposed for the
    feature-major kernel).  MXU-layer weights (w2t, w3t) stored bf16; biases and the
    tiny VPU-layer w1t stay f32.  Biases stored as (out, 1) columns."""
    ks = jax.random.split(key, 6)

    def lin(kw, kb, fan_in, fan_out, w_dtype):
        bound = 1.0 / jnp.sqrt(float(fan_in))
        wt = jax.random.uniform(kw, (fan_out, fan_in), jnp.float32, -bound, bound)
        b = jax.random.uniform(kb, (fan_out, 1), jnp.float32, -bound, bound)
        return wt.astype(w_dtype), b

    w1t, b1 = lin(ks[0], ks[1], STATE_DIM, HIDDEN, jnp.float32)
    w2t, b2 = lin(ks[2], ks[3], HIDDEN, HIDDEN, jnp.bfloat16)
    w3t, b3 = lin(ks[4], ks[5], HIDDEN, ACTION_DIM, jnp.bfloat16)
    return {"w1t": w1t, "b1": b1, "w2t": w2t, "b2": b2, "w3t": w3t, "b3": b3}


def dqn_reference(x, params):
    """Pure-JAX f32 reference (weights upcast from their storage dtype)."""
    w1 = params["w1t"].astype(jnp.float32).T
    w2 = params["w2t"].astype(jnp.float32).T
    w3 = params["w3t"].astype(jnp.float32).T
    h = jnp.maximum(x @ w1 + params["b1"].T, 0.0)
    h = jnp.maximum(h @ w2 + params["b2"].T, 0.0)
    return h @ w3 + params["b3"].T


if __name__ == "__main__":
    key = jax.random.PRNGKey(0)
    k_params, k_x = jax.random.split(key)
    params = init_params(k_params)

    fwd = jax.jit(dqn_forward)

    # Small acting-style batch (single, partially-filled lane tile).
    batch = 8
    x_small = jax.random.normal(k_x, (batch, STATE_DIM), jnp.float32)
    q_small = fwd(x_small, params)
    jax.block_until_ready(q_small)
    assert q_small.shape == (batch, ACTION_DIM)
    assert jnp.allclose(q_small, dqn_reference(x_small, params), atol=2e-2, rtol=2e-2)

    # Replay-buffer-style batch whose size is not a multiple of 128, exercising the
    # masked partial last block (and the 2-tile split when 2 TensorCores are reported).
    x_big = jax.random.normal(jax.random.PRNGKey(1), (300, STATE_DIM), jnp.float32)
    q_big = fwd(x_big, params)
    jax.block_until_ready(q_big)
    assert q_big.shape == (300, ACTION_DIM)
    assert jnp.allclose(q_big, dqn_reference(x_big, params), atol=2e-2, rtol=2e-2)

    print("KERNEL_OK")
</pallas_src>

<mosaic_0001>
module attributes {stable_mosaic.version = 11 : i64} {
  func.func @dqn_kernel(%arg0: i32, %arg1: memref<4x128xf32, #tpu.memory_space<vmem>>, %arg2: memref<128x4xf32, #tpu.memory_space<vmem>>, %arg3: memref<128x1xf32, #tpu.memory_space<vmem>>, %arg4: memref<128x128xbf16, #tpu.memory_space<vmem>>, %arg5: memref<128x1xf32, #tpu.memory_space<vmem>>, %arg6: memref<2x128xbf16, #tpu.memory_space<vmem>>, %arg7: memref<2x1xf32, #tpu.memory_space<vmem>>, %arg8: memref<2x128xf32, #tpu.memory_space<vmem>>) attributes {dimension_semantics = [#tpu.dimension_semantics<parallel>], iteration_bounds = array<i64: 1>, scalar_prefetch = 0 : i64, scratch_operands = 0 : i64, tpu.core_type = #tpu.core_type<tc>, window_params = [{transform_indices = @transform_0, window_bounds = array<i64: 4, 128>}, {pipeline_mode = #tpu.pipeline_mode<synchronous>, transform_indices = @transform_1, window_bounds = array<i64: 128, 4>}, {pipeline_mode = #tpu.pipeline_mode<synchronous>, transform_indices = @transform_2, window_bounds = array<i64: 128, 1>}, {pipeline_mode = #tpu.pipeline_mode<synchronous>, transform_indices = @transform_3, window_bounds = array<i64: 128, 128>}, {pipeline_mode = #tpu.pipeline_mode<synchronous>, transform_indices = @transform_4, window_bounds = array<i64: 128, 1>}, {pipeline_mode = #tpu.pipeline_mode<synchronous>, transform_indices = @transform_5, window_bounds = array<i64: 2, 128>}, {pipeline_mode = #tpu.pipeline_mode<synchronous>, transform_indices = @transform_6, window_bounds = array<i64: 2, 1>}, {transform_indices = @transform_7, window_bounds = array<i64: 2, 128>}]} {
    %c0 = arith.constant 0 : index
    %c0_0 = arith.constant 0 : index
    %0 = vector.load %arg1[%c0, %c0_0] : memref<4x128xf32, #tpu.memory_space<vmem>>, vector<4x128xf32>
    %c0_1 = arith.constant 0 : index
    %c0_2 = arith.constant 0 : index
    %1 = vector.load %arg2[%c0_1, %c0_2] : memref<128x4xf32, #tpu.memory_space<vmem>>, vector<128x4xf32>
    %2 = vector.extract_strided_slice %1 {offsets = [0, 0], sizes = [128, 1], strides = [1, 1]} : vector<128x4xf32> to vector<128x1xf32>
    %3 = vector.extract_strided_slice %0 {offsets = [0, 0], sizes = [1, 128], strides = [1, 1]} : vector<4x128xf32> to vector<1x128xf32>
    %4 = vector.broadcast %2 : vector<128x1xf32> to vector<128x128xf32>
    %5 = vector.broadcast %3 : vector<1x128xf32> to vector<128x128xf32>
    %6 = arith.mulf %4, %5 : vector<128x128xf32>
    %7 = vector.extract_strided_slice %1 {offsets = [0, 1], sizes = [128, 1], strides = [1, 1]} : vector<128x4xf32> to vector<128x1xf32>
    %8 = vector.extract_strided_slice %0 {offsets = [1, 0], sizes = [1, 128], strides = [1, 1]} : vector<4x128xf32> to vector<1x128xf32>
    %9 = vector.broadcast %7 : vector<128x1xf32> to vector<128x128xf32>
    %10 = vector.broadcast %8 : vector<1x128xf32> to vector<128x128xf32>
    %11 = arith.mulf %9, %10 : vector<128x128xf32>
    %12 = arith.addf %6, %11 : vector<128x128xf32>
    %13 = vector.extract_strided_slice %1 {offsets = [0, 2], sizes = [128, 1], strides = [1, 1]} : vector<128x4xf32> to vector<128x1xf32>
    %14 = vector.extract_strided_slice %0 {offsets = [2, 0], sizes = [1, 128], strides = [1, 1]} : vector<4x128xf32> to vector<1x128xf32>
    %15 = vector.broadcast %13 : vector<128x1xf32> to vector<128x128xf32>
    %16 = vector.broadcast %14 : vector<1x128xf32> to vector<128x128xf32>
    %17 = arith.mulf %15, %16 : vector<128x128xf32>
    %18 = arith.addf %12, %17 : vector<128x128xf32>
    %19 = vector.extract_strided_slice %1 {offsets = [0, 3], sizes = [128, 1], strides = [1, 1]} : vector<128x4xf32> to vector<128x1xf32>
    %20 = vector.extract_strided_slice %0 {offsets = [3, 0], sizes = [1, 128], strides = [1, 1]} : vector<4x128xf32> to vector<1x128xf32>
    %21 = vector.broadcast %19 : vector<128x1xf32> to vector<128x128xf32>
    %22 = vector.broadcast %20 : vector<1x128xf32> to vector<128x128xf32>
    %23 = arith.mulf %21, %22 : vector<128x128xf32>
    %24 = arith.addf %18, %23 : vector<128x128xf32>
    %c0_3 = arith.constant 0 : index
    %c0_4 = arith.constant 0 : index
    %25 = vector.load %arg3[%c0_3, %c0_4] : memref<128x1xf32, #tpu.memory_space<vmem>>, vector<128x1xf32>
    %26 = vector.broadcast %25 : vector<128x1xf32> to vector<128x128xf32>
    %27 = arith.addf %24, %26 : vector<128x128xf32>
    %cst = arith.constant 0.000000e+00 : f32
    %28 = vector.broadcast %cst : f32 to vector<128x128xf32>
    %29 = arith.maximumf %27, %28 : vector<128x128xf32>
    %c0_5 = arith.constant 0 : index
    %c0_6 = arith.constant 0 : index
    %30 = vector.load %arg4[%c0_5, %c0_6] : memref<128x128xbf16, #tpu.memory_space<vmem>>, vector<128x128xbf16>
    %31 = arith.truncf %29 : vector<128x128xf32> to vector<128x128xbf16>
    %cst_7 = arith.constant dense<0.000000e+00> : vector<128x128xf32>
    %32 = tpu.matmul %30, %31, %cst_7 {dimension_numbers = #tpu.dot_dimension_numbers<[1], [0], [0], [1], [0, 0, 1, 1], [], []>} : vector<128x128xbf16>, vector<128x128xbf16>, vector<128x128xf32> -> vector<128x128xf32>
    %c0_8 = arith.constant 0 : index
    %c0_9 = arith.constant 0 : index
    %33 = vector.load %arg5[%c0_8, %c0_9] : memref<128x1xf32, #tpu.memory_space<vmem>>, vector<128x1xf32>
    %34 = vector.broadcast %33 : vector<128x1xf32> to vector<128x128xf32>
    %35 = arith.addf %32, %34 : vector<128x128xf32>
    %cst_10 = arith.constant 0.000000e+00 : f32
    %36 = vector.broadcast %cst_10 : f32 to vector<128x128xf32>
    %37 = arith.maximumf %35, %36 : vector<128x128xf32>
    %c0_11 = arith.constant 0 : index
    %c0_12 = arith.constant 0 : index
    %38 = vector.load %arg6[%c0_11, %c0_12] : memref<2x128xbf16, #tpu.memory_space<vmem>>, vector<2x128xbf16>
    %39 = arith.truncf %37 : vector<128x128xf32> to vector<128x128xbf16>
    %cst_13 = arith.constant dense<0.000000e+00> : vector<2x128xf32>
    %40 = tpu.matmul %38, %39, %cst_13 {dimension_numbers = #tpu.dot_dimension_numbers<[1], [0], [0], [1], [0, 0, 1, 1], [], []>} : vector<2x128xbf16>, vector<128x128xbf16>, vector<2x128xf32> -> vector<2x128xf32>
    %c0_14 = arith.constant 0 : index
    %c0_15 = arith.constant 0 : index
    %41 = vector.load %arg7[%c0_14, %c0_15] : memref<2x1xf32, #tpu.memory_space<vmem>>, vector<2x1xf32>
    %42 = vector.broadcast %41 : vector<2x1xf32> to vector<2x128xf32>
    %43 = arith.addf %40, %42 : vector<2x128xf32>
    %c0_16 = arith.constant 0 : index
    %c0_17 = arith.constant 0 : index
    %44 = vector.load %arg8[%c0_16, %c0_17] : memref<2x128xf32, #tpu.memory_space<vmem>>, vector<2x128xf32>
    tpu.vector_store %arg8[%c0_16, %c0_17], %43 {strides = array<i32>} : memref<2x128xf32, #tpu.memory_space<vmem>>, vector<2x128xf32>,
    return
  }
  func.func @transform_0(%arg0: i32) -> (i32, i32) {
    %c0_i32 = arith.constant 0 : i32
    %c0_i32_0 = arith.constant 0 : i32
    return %c0_i32, %arg0 : i32, i32
  }
  func.func @transform_1(%arg0: i32) -> (i32, i32) {
    %c0_i32 = arith.constant 0 : i32
    %c0_i32_0 = arith.constant 0 : i32
    %c0_i32_1 = arith.constant 0 : i32
    return %c0_i32, %c0_i32_0 : i32, i32
  }
  func.func @transform_2(%arg0: i32) -> (i32, i32) {
    %c0_i32 = arith.constant 0 : i32
    %c0_i32_0 = arith.constant 0 : i32
    %c0_i32_1 = arith.constant 0 : i32
    return %c0_i32, %c0_i32_0 : i32, i32
  }
  func.func @transform_3(%arg0: i32) -> (i32, i32) {
    %c0_i32 = arith.constant 0 : i32
    %c0_i32_0 = arith.constant 0 : i32
    %c0_i32_1 = arith.constant 0 : i32
    return %c0_i32, %c0_i32_0 : i32, i32
  }
  func.func @transform_4(%arg0: i32) -> (i32, i32) {
    %c0_i32 = arith.constant 0 : i32
    %c0_i32_0 = arith.constant 0 : i32
    %c0_i32_1 = arith.constant 0 : i32
    return %c0_i32, %c0_i32_0 : i32, i32
  }
  func.func @transform_5(%arg0: i32) -> (i32, i32) {
    %c0_i32 = arith.constant 0 : i32
    %c0_i32_0 = arith.constant 0 : i32
    %c0_i32_1 = arith.constant 0 : i32
    return %c0_i32, %c0_i32_0 : i32, i32
  }
  func.func @transform_6(%arg0: i32) -> (i32, i32) {
    %c0_i32 = arith.constant 0 : i32
    %c0_i32_0 = arith.constant 0 : i32
    %c0_i32_1 = arith.constant 0 : i32
    return %c0_i32, %c0_i32_0 : i32, i32
  }
  func.func @transform_7(%arg0: i32) -> (i32, i32) {
    %c0_i32 = arith.constant 0 : i32
    %c0_i32_0 = arith.constant 0 : i32
    return %c0_i32, %arg0 : i32, i32
  }
}

</mosaic_0001>

<bundles_post_ra>
// kernel: dqn_forward.1
= control target key start
LH: loop header
LB: loop body
LE: loop exit
PB: predicated region body
PF: predicated region fallthrough
CT: control target
= control target key end

     0   :  { %v1088_v2 = vmov 1   ;;  %v1089_v6 = vmov 2   ;;  %s1594_s0 = inlined_call_operand.vmem [shape: f32[4,8], index: 0, kind: input, shape index: {}]   ;;  %s1595_s1 = inlined_call_operand.vmem [shape: f32[128,4], index: 1, kind: input, shape index: {}]   ;;  %s1596_s2 = inlined_call_operand.vmem [shape: f32[128,1], index: 2, kind: input, shape index: {}]   ;;  %s1597_s3 = inlined_call_operand.vmem [shape: bf16[128,128], index: 3, kind: input, shape index: {}]   ;;  %s1598_s4 = inlined_call_operand.vmem [shape: f32[128,1], index: 4, kind: input, shape index: {}]   ;;  %s1599_s5 = inlined_call_operand.vmem [shape: bf16[2,128], index: 5, kind: input, shape index: {}]   ;;  %s1600_s6 = inlined_call_operand.vmem [shape: f32[2,1], index: 6, kind: input, shape index: {}]   ;;  %s1601_s7 = inlined_call_operand.hbm [shape: f32[2,8], index: 7, kind: output, shape index: {}]  }
   0x1   :  { %v1138_v0 = vld [vmem:[%s1595_s1 + $0x70] sm:$0xff]  ;;  %1023 = vset.pattern.permute.xlu0 %v1088_v2  ;;  %1016 = vset.pattern.permute.xlu1 %v1088_v2  ;;  %v44_v3 = vld [vmem:[%s1595_s1 + $0x78] sm:$0xff] }
   0x2   :  { %v39_v1 = vld [vmem:[%s1595_s1 + $0x50] sm:$0xff]  ;;  %202 = vperm.xlu1 %1016, %v1138_v0  }
   0x3   :  { %186 = vperm.xlu0 %1023, %v39_v1   ;;  %v1152_v4 = vld [vmem:[%s1595_s1 + $0x30] sm:$0xff] }
   0x4   :  { %v1158_v5 = vld [vmem:[%s1595_s1 + $0x10] sm:$0xff] }
   0x6   :  { %206 = vperm.xlu1 %1016, %v44_v3  }
   0x7   :  { %170 = vperm.xlu0 %1023, %v1152_v4  }
   0xa   :  { %1017 = vset.pattern.permute.xlu1 %v1089_v6 }
   0xb   :  { %154 = vperm.xlu0 %1023, %v1158_v5   ;;  %306 = vperm.xlu1 %1017, %v44_v3  }
   0xc   :  { %12 = vsyncpa [#allocation3], 0  ;;  %v41_v7 = vld [vmem:[%s1595_s1 + $0x60] sm:$0xff]  ;;  %v1090_v8 = vmov 0   ;;  %v42_v9 = vld [vmem:[%s1595_s1 + $0x68] sm:$0xff]  ;;  %v1091_v10 = vmov 3   ;;  %v125_v48 = vlaneseq }
   0xd   :  { %v40_v11 = vld [vmem:[%s1595_s1 + $0x58] sm:$0xff]  ;;  %v38_v12 = vld [vmem:[%s1595_s1 + $0x48] sm:$0xff]  ;;  %v459_v14 = vld [vmem:[%s1596_s2 + $0x70] sm:$0xff]  ;;  %vm1093_vm0 = vmmov 0   ;;  %s1094_s17 = smov [#allocation2]  }
   0xe   :  { %v1191_v13 = vld [vmem:[%s1595_s1 + $0x28] sm:$0xff]  ;;  %v460_v15 = vld [vmem:[%s1596_s2 + $0x78] sm:$0xff]  ;;  %v1205_v16 = vld [vmem:[%s1595_s1] sm:$0xff]  ;;  %v126_v52 = vshrl.u32 %v125_v48, 7  ;;  %s916_s18 = sshll.u32 %s1094_s17, 4  ;;  %s917_s18 = int_to_ptr.vmem [resolvable:$true] %s916_s18 }
   0xf   :  { %1044 = vset.pattern.permute.xlu0 %v1089_v6  ;;  %1018 = vset.pattern.permute.xlu1 %v1090_v8  ;;  %v37_v17 = vld [vmem:[%s1595_s1 + $0x40] sm:$0xff]  ;;  %v458_v18 = vld [vmem:[%s1596_s2 + $0x68] sm:$0xff]  ;;  %v36_v22 = vld [vmem:[%s1595_s1 + $0x38] sm:$0xff]  ;;  %s1066_s19 = scalar_lea.vmem %s917_s18, 32  ;;  %p1071_p1 = scmp.lt.s32.totalorder %s917_s18, %s917_s18 }
  0x10   :  { %302 = vperm.xlu0 %1044, %v1138_v0   ;;  %107 = vperm.xlu1 %1018, %v41_v7   ;;  %v457_v19 = vld [vmem:[%s1596_s2 + $0x60] sm:$0xff]  ;;  %v454_v20 = vld [vmem:[%s1596_s2 + $0x48] sm:$0xff]  ;;  %v448_v24 = vld [vmem:[%s1596_s2 + $0x18] sm:$0xff]  ;;  %v211_v55 = vsub.s32 1, %v126_v52  ;;  %v311_v57 = vsub.s32 2, %v126_v52  ;;  %v127_v58 = vsub.s32 0, %v126_v52  ;;  %p1067_p0 = scmp.ne.s32.totalorder %s917_s18, %s1066_s19  ;;  %p1072_p2 = scmp.lt.s32.totalorder %s1066_s19, %s1066_s19 }
  0x11   :  { %v1234_v21 = vld [vmem:[%s1595_s1 + $0x8] sm:$0xff]  ;;  %v611_v25 = vld [vmem:[%s1598_s4 + $0x70] sm:$0xff]  ;;  %v609_v27 = vld [vmem:[%s1598_s4 + $0x60] sm:$0xff] }
  0x12   :  { %v450_v23 = vld [vmem:[%s1596_s2 + $0x28] sm:$0xff]  ;;  %v455_v26 = vld [vmem:[%s1596_s2 + $0x50] sm:$0xff]  ;;  %v456_v28 = vld [vmem:[%s1596_s2 + $0x58] sm:$0xff]  ;;  %p1073_p3 = por %p1072_p2, %p1071_p1 }
  0x13   :  { %v607_v29 = vld [vmem:[%s1598_s4 + $0x50] sm:$0xff]  ;;  %v605_v32 = vld [vmem:[%s1598_s4 + $0x40] sm:$0xff] }
  0x14   :  { %298 = vperm.xlu0 %1044, %v42_v9   ;;  %1019 = vset.pattern.permute.xlu1 %v1088_v2  ;;  %v603_v35 = vld [vmem:[%s1598_s4 + $0x30] sm:$0xff]  ;;  %v1281_v36 = vld [vmem:[%s1595_s1 + $0x20] sm:$0xff]  ;;  %p1074_p4 = pnand %p1073_p3, %p1067_p0 }
  0x15   :  { %194 = vperm.xlu1 %1019, %v41_v7   ;;  %v601_v39 = vld [vmem:[%s1598_s4 + $0x20] sm:$0xff]  ;;  %v599_v41 = vld [vmem:[%s1598_s4 + $0x10] sm:$0xff] }
  0x16   :  { %v597_v44 = vld [vmem:[%s1598_s4] sm:$0xff] }
  0x17   :  { %v863_v47 = vld [vmem:[%s1600_s6] sm:$0x3] }
  0x18   :  { %286 = vperm.xlu0 %1044, %v39_v1   ;;  %v453_v51 = vld [vmem:[%s1596_s2 + $0x40] sm:$0xff] }
  0x19   :  { %198 = vperm.xlu1 %1019, %v42_v9   ;;  %v28_v56 = vld [vmem:[%s1594_s0] sm:$0xf] }
  0x1a   :  { %v1332_v61 = vrot.slane %v28_v56, %v211_v55  ;;  %v1335_v63 = vrot.slane %v28_v56, %v311_v57 }
  0x1c   :  { %270 = vperm.xlu0 %1044, %v1152_v4  }
  0x1d   :  { %1020 = vset.pattern.permute.xlu1 %v1091_v10 }
  0x1e   :  { %406 = vperm.xlu1 %1020, %v44_v3  }
  0x20   :  { %254 = vperm.xlu0 %1044, %v1158_v5  }
  0x22   :  { %1021 = vset.pattern.permute.xlu1 %v1089_v6 }
  0x23   :  { %294 = vperm.xlu1 %1021, %v41_v7  }
  0x24   :  { %1048 = vset.pattern.permute.xlu0 %v1091_v10 }
  0x25   :  { %402 = vperm.xlu0 %1048, %v1138_v0  }
  0x27   :  { %1022 = vset.pattern.permute.xlu1 %v1090_v8 }
  0x28   :  { %97 = vperm.xlu1 %1022, %v39_v1  }
  0x29   :  { %398 = vperm.xlu0 %1048, %v42_v9  }
  0x2c   :  { %102 = vperm.xlu1 %1022, %v40_v11  }
  0x2d   :  { %386 = vperm.xlu0 %1048, %v39_v1   ;;  %v411_v1 = vsub.s32 3, %v126_v52 }
  0x30   :  { %1024 = vset.pattern.permute.xlu1 %v1088_v2 }
  0x31   :  { %382 = vperm.xlu0 %1048, %v38_v12   ;;  %190 = vperm.xlu1 %1024, %v40_v11  }
  0x35   :  { %370 = vperm.xlu0 %1048, %v1152_v4   ;;  %1025 = vset.pattern.permute.xlu1 %v1091_v10 }
  0x36   :  { %394 = vperm.xlu1 %1025, %v41_v7  }
  0x39   :  { %366 = vperm.xlu0 %1048, %v1191_v13  }
  0x3a   :  { %1026 = vset.pattern.permute.xlu1 %v1090_v8 }
  0x3b   :  { %533 = vperm.xlu1 %1026, %v459_v14  }
  0x3d   :  { %354 = vperm.xlu0 %1048, %v1158_v5  }
  0x3f   :  { %538 = vperm.xlu1 %1026, %v460_v15  }
  0x41   :  { %346 = vperm.xlu0 %1048, %v1205_v16  }
  0x43   :  { %1027 = vset.pattern.permute.xlu1 %v1089_v6 }
  0x44   :  { %290 = vperm.xlu1 %1027, %v40_v11  }
  0x45   :  { %1055 = vset.pattern.permute.xlu0 %v1090_v8 }
  0x46   :  { %117 = vperm.xlu0 %1055, %v1138_v0   ;;  %v1337_v0 = vrot.slane %v28_v56, %v127_v58 }
  0x48   :  { %1028 = vset.pattern.permute.xlu1 %v1090_v8 }
  0x49   :  { %87 = vperm.xlu1 %1028, %v37_v17  }
  0x4a   :  { %122 = vperm.xlu0 %1055, %v44_v3  }
  0x4d   :  { %1029 = vset.pattern.permute.xlu1 %v1088_v2 }
  0x4e   :  { %112 = vperm.xlu0 %1055, %v42_v9   ;;  %178 = vperm.xlu1 %1029, %v37_v17   ;;  %v1347_v9 = vld [vmem:[%s1595_s1 + $0x18] sm:$0xff] }
  0x52   :  { %92 = vperm.xlu0 %1055, %v38_v12   ;;  %182 = vperm.xlu1 %1029, %v38_v12  }
  0x56   :  { %528 = vperm.xlu0 %1055, %v458_v18   ;;  %1030 = vset.pattern.permute.xlu1 %v1091_v10 }
  0x57   :  { %390 = vperm.xlu1 %1030, %v40_v11   ;;  %v1349_v11 = vrot.slane %v28_v56, %v411_v1 }
  0x5a   :  { %77 = vperm.xlu0 %1055, %v1152_v4  }
  0x5b   :  { %1031 = vset.pattern.permute.xlu1 %v1090_v8 }
  0x5c   :  { %523 = vperm.xlu1 %1031, %v457_v19  }
  0x5e   :  { %72 = vperm.xlu0 %1055, %v1191_v13  }
  0x60   :  { %1032 = vset.pattern.permute.xlu1 %v1089_v6 }
  0x61   :  { %278 = vperm.xlu1 %1032, %v37_v17  }
  0x62   :  { %508 = vperm.xlu0 %1055, %v454_v20  }
  0x65   :  { %282 = vperm.xlu1 %1032, %v38_v12  }
  0x66   :  { %57 = vperm.xlu0 %1055, %v1158_v5  }
  0x69   :  { %1033 = vset.pattern.permute.xlu1 %v1090_v8 }
  0x6a   :  { %52 = vperm.xlu0 %1055, %v1234_v21   ;;  %82 = vperm.xlu1 %1033, %v36_v22  }
  0x6e   :  { %488 = vperm.xlu0 %1055, %v450_v23   ;;  %1034 = vset.pattern.permute.xlu1 %v1088_v2 }
  0x6f   :  { %174 = vperm.xlu1 %1034, %v36_v22  }
  0x72   :  { %478 = vperm.xlu0 %1055, %v448_v24  }
  0x73   :  { %1035 = vset.pattern.permute.xlu1 %v1091_v10 }
  0x74   :  { %378 = vperm.xlu1 %1035, %v37_v17  }
  0x76   :  { %685 = vperm.xlu0 %1055, %v611_v25   ;;  %v451_v25 = vld [vmem:[%s1596_s2 + $0x30] sm:$0xff] }
  0x78   :  { %1036 = vset.pattern.permute.xlu1 %v1090_v8 }
  0x79   :  { %513 = vperm.xlu1 %1036, %v455_v26  }
  0x7a   :  { %675 = vperm.xlu0 %1055, %v609_v27  }
  0x7d   :  { %v1265_v30 = vpop.permute.xlu1 %202  ;;  %518 = vperm.xlu1 %1036, %v456_v28   ;;  %v452_v28 = vld [vmem:[%s1596_s2 + $0x38] sm:$0xff] }
  0x7e   :  { %v187_v31 = vpop.permute.xlu0 %186  ;;  %665 = vperm.xlu0 %1055, %v607_v29  }
  0x7f   :  { %v223_v62 = vmul.f32 %v1332_v61, %v187_v31 }
  0x81   :  { %v1270_v33 = vpop.permute.xlu1 %206  ;;  %1037 = vset.pattern.permute.xlu1 %v1089_v6 }
  0x82   :  { %v1273_v34 = vpop.permute.xlu0 %170  ;;  %655 = vperm.xlu0 %1055, %v605_v32   ;;  %274 = vperm.xlu1 %1037, %v36_v22  }
  0x86   :  { %v1283_v37 = vpop.permute.xlu0 %154  ;;  %645 = vperm.xlu0 %1055, %v603_v35   ;;  %v1285_v38 = vpop.permute.xlu1 %306  ;;  %1038 = vset.pattern.permute.xlu1 %v1090_v8 }
  0x87   :  { %67 = vperm.xlu1 %1038, %v1281_v36  }
  0x8a   :  { %635 = vperm.xlu0 %1055, %v601_v39  }
  0x8b   :  { %v1292_v40 = vpop.permute.xlu0 %302  ;;  %v1297_v42 = vpop.permute.xlu1 %107  ;;  %1039 = vset.pattern.permute.xlu1 %v1088_v2 }
  0x8c   :  { %162 = vperm.xlu1 %1039, %v1281_v36   ;;  %v327_v39 = vmul.f32 %v1335_v63, %v1292_v40 }
  0x8e   :  { %625 = vperm.xlu0 %1055, %v599_v41  }
  0x8f   :  { %v1301_v43 = vpop.permute.xlu0 %298 }
  0x90   :  { %v1306_v45 = vpop.permute.xlu1 %194  ;;  %166 = vperm.xlu1 %1039, %v1191_v13  }
  0x92   :  { %615 = vperm.xlu0 %1055, %v597_v44  }
  0x93   :  { %v287_v46 = vpop.permute.xlu0 %286 }
  0x94   :  { %v1312_v49 = vpop.permute.xlu1 %198  ;;  %1040 = vset.pattern.permute.xlu1 %v1091_v10  ;;  %v323_v5 = vmul.f32 %v1335_v63, %v287_v46 }
  0x95   :  { %374 = vperm.xlu1 %1040, %v36_v22   ;;  %v226_v58 = vmul.f32 %v1332_v61, %v1312_v49 }
  0x96   :  { %866 = vperm.xlu0 %1055, %v863_v47  }
  0x97   :  { %v1315_v50 = vpop.permute.xlu0 %270 }
  0x99   :  { %v1320_v53 = vpop.permute.xlu1 %406  ;;  %1041 = vset.pattern.permute.xlu1 %v1090_v8 }
  0x9a   :  { %503 = vperm.xlu1 %1041, %v453_v51   ;;  %v228_v51 = vmul.f32 %v1332_v61, %v1270_v33 }
  0x9b   :  { %v1323_v54 = vpop.permute.xlu0 %254 }
  0x9e   :  { %v1328_v59 = vpop.permute.xlu1 %294  ;;  %1042 = vset.pattern.permute.xlu1 %v1089_v6 }
  0x9f   :  { %262 = vperm.xlu1 %1042, %v1281_v36  }
  0xa0   :  { %v403_v60 = vpop.permute.xlu0 %402 }
  0xa1   :  { %v427_v44 = vmul.f32 %v1349_v11, %v403_v60  ;;  %v428_v60 = vmul.f32 %v1349_v11, %v1320_v53 }
  0xa3   :  { %v98_v3 = vpop.permute.xlu1 %97  ;;  %266 = vperm.xlu1 %1042, %v1191_v13  }
  0xa4   :  { %v1340_v4 = vpop.permute.xlu0 %398  ;;  %v139_v7 = vmul.f32 %v1337_v0, %v98_v3  ;;  %v326_v3 = vmul.f32 %v1335_v63, %v1301_v43 }
  0xa5   :  { %v426_v43 = vmul.f32 %v1349_v11, %v1340_v4  ;;  %v219_v4 = vmul.f32 %v1332_v61, %v1273_v34 }
  0xa6   :  { %v239_v12 = vadd.f32 %v223_v62, %v139_v7 }
  0xa7   :  { %v1351_v14 = vpop.permute.xlu1 %102  ;;  %1043 = vset.pattern.permute.xlu1 %v1090_v8 }
  0xa8   :  { %v387_v15 = vpop.permute.xlu0 %386  ;;  %62 = vperm.xlu1 %1043, %v1347_v9   ;;  %v339_v17 = vadd.f32 %v323_v5, %v239_v12 }
  0xa9   :  { %v423_v13 = vmul.f32 %v1349_v11, %v387_v15 }
  0xab   :  { %v1356_v18 = vadd.f32 %v423_v13, %v339_v17 }
  0xac   :  { %v1358_v19 = vpop.permute.xlu0 %382  ;;  %v1360_v20 = vpop.permute.xlu1 %190  ;;  %1045 = vset.pattern.permute.xlu1 %v1088_v2 }
  0xad   :  { %158 = vperm.xlu1 %1045, %v1347_v9  }
  0xb0   :  { %v1364_v22 = vpop.permute.xlu0 %370 }
  0xb1   :  { %v395_v23 = vpop.permute.xlu1 %394  ;;  %1046 = vset.pattern.permute.xlu1 %v1091_v10  ;;  %v419_v34 = vmul.f32 %v1349_v11, %v1364_v22  ;;  %v215_v22 = vmul.f32 %v1332_v61, %v1283_v37 }
  0xb2   :  { %362 = vperm.xlu1 %1046, %v1281_v36   ;;  %v227_v36 = vmul.f32 %v1332_v61, %v1265_v30  ;;  %v328_v30 = vmul.f32 %v1335_v63, %v1285_v38 }
  0xb4   :  { %v1368_v24 = vpop.permute.xlu0 %366 }
  0xb6   :  { %v534_v26 = vpop.permute.xlu1 %533  ;;  %1047 = vset.pattern.permute.xlu1 %v1090_v8 }
  0xb7   :  { %493 = vperm.xlu1 %1047, %v451_v25  }
  0xb8   :  { %v1374_v27 = vpop.permute.xlu0 %354 }
  0xba   :  { %v539_v29 = vpop.permute.xlu1 %538 }
  0xbb   :  { %498 = vperm.xlu1 %1047, %v452_v28  }
  0xbc   :  { %v1379_v31 = vpop.permute.xlu0 %346 }
  0xbf   :  { %v1381_v32 = vpop.permute.xlu1 %290  ;;  %1049 = vset.pattern.permute.xlu1 %v1089_v6 }
  0xc0   :  { %258 = vperm.xlu1 %1049, %v1347_v9  }
  0xc1   :  { %v118_v35 = vpop.permute.xlu0 %117 }
  0xc2   :  { %v143_v41 = vmul.f32 %v1337_v0, %v118_v35 }
  0xc4   :  { %v243_v46 = vadd.f32 %v227_v36, %v143_v41  ;;  %v88_v47 = vpop.permute.xlu1 %87  ;;  %1050 = vset.pattern.permute.xlu1 %v1090_v8  ;;  %v325_v36 = vmul.f32 %v1335_v63, %v1328_v59  ;;  %v319_v59 = vmul.f32 %v1335_v63, %v1315_v50 }
  0xc5   :  { %v123_v48 = vpop.permute.xlu0 %122  ;;  %47 = vperm.xlu1 %1050, %v1205_v16   ;;  %v137_v38 = vmul.f32 %v1337_v0, %v88_v47 }
  0xc6   :  { %v343_v52 = vadd.f32 %v327_v39, %v243_v46  ;;  %v144_v55 = vmul.f32 %v1337_v0, %v123_v48 }
  0xc8   :  { %v244_v40 = vadd.f32 %v228_v51, %v144_v55  ;;  %v443_v56 = vadd.f32 %v427_v44, %v343_v52  ;;  %v425_v44 = vmul.f32 %v1349_v11, %v395_v23  ;;  %v449_v23 = vld [vmem:[%s1596_s2 + $0x20] sm:$0xff] }
  0xc9   :  { %v113_v57 = vpop.permute.xlu0 %112  ;;  %v179_v1 = vpop.permute.xlu1 %178  ;;  %1051 = vset.pattern.permute.xlu1 %v1088_v2  ;;  %v225_v2 = vmul.f32 %v1332_v61, %v1306_v45 }
  0xca   :  { %v344_v62 = vadd.f32 %v328_v30, %v244_v40  ;;  %v142_v33 = vmul.f32 %v1337_v0, %v113_v57  ;;  %v221_v5 = vmul.f32 %v1332_v61, %v179_v1  ;;  %146 = vperm.xlu1 %1051, %v1205_v16   ;;  %v555_v12 = vadd.f32 %v534_v26, %v443_v56 }
  0xcb   :  { %v141_v26 = vmul.f32 %v1337_v0, %v1297_v42 }
  0xcc   :  { %v242_v7 = vadd.f32 %v226_v58, %v142_v33  ;;  %v444_v49 = vadd.f32 %v428_v60, %v344_v62  ;;  %v1409_v15 = vadd.f32 %v221_v5, %v137_v38  ;;  %v571_v28 = vmax.f32 %v555_v12, 0.0 }
  0xcd   :  { %v1411_v53 = vpop.permute.xlu0 %92  ;;  %v1413_v13 = vpop.permute.xlu1 %182  ;;  %v315_v38 = vmul.f32 %v1335_v63, %v1323_v54  ;;  %v447_v54 = vld [vmem:[%s1596_s2 + $0x10] sm:$0xff] }
  0xce   :  { %v556_v17 = vadd.f32 %v539_v29, %v444_v49  ;;  %150 = vperm.xlu1 %1051, %v1234_v21   ;;  %v342_v25 = vadd.f32 %v326_v3, %v242_v7  ;;  %v241_v29 = vadd.f32 %v225_v2, %v141_v26 }
  0xd0   :  { %v572_v35 = vmax.f32 %v556_v17, 0.0  ;;  %v442_v45 = vadd.f32 %v426_v43, %v342_v25  ;;  %v341_v47 = vadd.f32 %v325_v36, %v241_v29  ;;  %v140_v25 = vmul.f32 %v1337_v0, %v1351_v14 }
  0xd1   :  { %v529_v39 = vpop.permute.xlu0 %528 }
  0xd2   :  { %v596_v41 = vpack.c.bf16 %v572_v35, %v571_v28  ;;  %v391_v46 = vpop.permute.xlu1 %390  ;;  %1052 = vset.pattern.permute.xlu1 %v1091_v10  ;;  %v554_v51 = vadd.f32 %v529_v39, %v442_v45  ;;  %v441_v52 = vadd.f32 %v425_v44, %v341_v47  ;;  %v324_v28 = vmul.f32 %v1335_v63, %v1381_v32  ;;  %v610_v32 = vld [vmem:[%s1598_s4 + $0x68] sm:$0xff]  ;;  %v608_v47 = vld [vmem:[%s1598_s4 + $0x58] sm:$0xff] }
  0xd3   :  { %358 = vperm.xlu1 %1052, %v1347_v9   ;;  %v424_v26 = vmul.f32 %v1349_v11, %v391_v46 }
  0xd4   :  { %957 = vmatprep.subr.bf16.mxu0 %v596_v41  ;;  %v570_v56 = vmax.f32 %v554_v51, 0.0  ;;  %v138_v51 = vmul.f32 %v1337_v0, %v1411_v53  ;;  %v422_v53 = vmul.f32 %v1349_v11, %v1358_v19 }
  0xd5   :  { %958 = vmatpush3.bf16.msra.mxu0 %v596_v41  ;;  %v78_v42 = vpop.permute.xlu0 %77  ;;  %v1058_v41 = vld [vmem:[%s1597_s3] sm:$0xff]  }
  0xd6   :  { %v135_v48 = vmul.f32 %v1337_v0, %v78_v42  ;;  %973 = vmatprep.mubr.bf16.mxu0 %v1058_v41 }
  0xd7   :  { %v524_v55 = vpop.permute.xlu1 %523  ;;  %1053 = vset.pattern.permute.xlu1 %v1090_v8 }
  0xd8   :  { %v235_v9 = vadd.f32 %v219_v4, %v135_v48  ;;  %v553_v30 = vadd.f32 %v524_v55, %v441_v52  ;;  %483 = vperm.xlu1 %1053, %v449_v23   ;;  %v604_v48 = vld [vmem:[%s1598_s4 + $0x38] sm:$0xff]  ;;  %v222_v52 = vmul.f32 %v1332_v61, %v1413_v13 }
  0xd9   :  { %v1438_v40 = vpop.permute.xlu0 %72 }
  0xda   :  { %v335_v50 = vadd.f32 %v319_v59, %v235_v9  ;;  %v569_v57 = vmax.f32 %v553_v30, 0.0 }
  0xdc   :  { %v1440_v58 = vadd.f32 %v419_v34, %v335_v50  ;;  %v595_v60 = vpack.c.bf16 %v570_v56, %v569_v57  ;;  %v1442_v62 = vpop.permute.xlu1 %278  ;;  %1054 = vset.pattern.permute.xlu1 %v1089_v6  ;;  %v415_v6 = vmul.f32 %v1349_v11, %v1374_v27  ;;  %v602_v50 = vld [vmem:[%s1598_s4 + $0x28] sm:$0xff]  ;;  %v238_v56 = vadd.f32 %v222_v52, %v138_v51 }
  0xdd   :  { %v1445_v33 = vpop.permute.xlu0 %508  ;;  %246 = vperm.xlu1 %1054, %v1205_v16  }
  0xde   :  { %959 = vmatprep.subr.bf16.mxu0 %v595_v60 }
  0xdf   :  { %960 = vmatpush3.bf16.msra.mxu0 %v595_v60 }
  0xe0   :  { %v283_v1 = vpop.permute.xlu1 %282 }
  0xe1   :  { %v58_v3 = vpop.permute.xlu0 %57  ;;  %250 = vperm.xlu1 %1054, %v1234_v21   ;;  %v322_v55 = vmul.f32 %v1335_v63, %v283_v1  ;;  %v321_v1 = vmul.f32 %v1335_v63, %v1442_v62 }
  0xe2   :  { %v131_v5 = vmul.f32 %v1337_v0, %v58_v3 }
  0xe3   :  { %v338_v13 = vadd.f32 %v322_v55, %v238_v56 }
  0xe4   :  { %v231_v7 = vadd.f32 %v215_v22, %v131_v5  ;;  %v600_v22 = vld [vmem:[%s1598_s4 + $0x18] sm:$0xff] }
  0xe5   :  { %v83_v49 = vpop.permute.xlu1 %82  ;;  %1056 = vset.pattern.permute.xlu1 %v1091_v10  ;;  %v445_v10 = vld [vmem:[%s1596_s2] sm:$0xff]  ;;  %v438_v3 = vadd.f32 %v422_v53, %v338_v13 }
  0xe6   :  { %v331_v16 = vadd.f32 %v315_v38, %v231_v7  ;;  %350 = vperm.xlu1 %1056, %v1234_v21   ;;  %v136_v17 = vmul.f32 %v1337_v0, %v83_v49  ;;  %v224_v21 = vmul.f32 %v1332_v61, %v1360_v20  ;;  %v612_v20 = vld [vmem:[%s1598_s4 + $0x78] sm:$0xff]  ;;  %v337_v7 = vadd.f32 %v321_v1, %v1409_v15 }
  0xe7   :  { %v550_v19 = vadd.f32 %v1445_v33, %v438_v3 }
  0xe8   :  { %v1458_v37 = vadd.f32 %v415_v6, %v331_v16  ;;  %v240_v35 = vadd.f32 %v224_v21, %v140_v25  ;;  %v598_v6 = vld [vmem:[%s1598_s4 + $0x8] sm:$0xff] }
  0xea   :  { %v175_v12 = vpop.permute.xlu1 %174  ;;  %1057 = vset.pattern.permute.xlu1 %v1090_v8  ;;  %v446_v8 = vld [vmem:[%s1596_s2 + $0x8] sm:$0xff]  ;;  %v340_v39 = vadd.f32 %v324_v28, %v240_v35 }
  0xeb   :  { %v220_v27 = vmul.f32 %v1332_v61, %v175_v12  ;;  %473 = vperm.xlu1 %1057, %v447_v54   ;;  %v566_v12 = vmax.f32 %v550_v19, 0.0 }
  0xec   :  { %v440_v14 = vadd.f32 %v424_v26, %v340_v39 }
  0xed   :  { %v1469_v2 = vadd.f32 %v220_v27, %v136_v17 }
  0xef   :  { %v379_v43 = vpop.permute.xlu1 %378  ;;  %463 = vperm.xlu1 %1057, %v445_v10  }
  0xf0   :  { %v421_v38 = vmul.f32 %v1349_v11, %v379_v43 }
  0xf2   :  { %v437_v49 = vadd.f32 %v421_v38, %v337_v7 }
  0xf3   :  { %468 = vperm.xlu1 %1057, %v446_v8  }
  0xf4   :  { %v514_v36 = vpop.permute.xlu1 %513 }
  0xf5   :  { %v551_v29 = vadd.f32 %v514_v36, %v1356_v18  ;;  %v606_v18 = vld [vmem:[%s1598_s4 + $0x48] sm:$0xff] }
  0xf7   :  { %690 = vperm.xlu1 %1057, %v612_v20   ;;  %v567_v46 = vmax.f32 %v551_v29, 0.0 }
  0xf8   :  { %v519_v44 = vpop.permute.xlu1 %518 }
  0xf9   :  { %v552_v45 = vadd.f32 %v519_v44, %v440_v14 }
  0xfb   :  { %v568_v4 = vmax.f32 %v552_v45, 0.0  ;;  %680 = vperm.xlu1 %1057, %v610_v32   ;;  %v134_v32 = vmul.f32 %v1337_v0, %v1438_v40 }
  0xfd   :  { %v594_v42 = vpack.c.bf16 %v568_v4, %v567_v46  ;;  %v275_v59 = vpop.permute.xlu1 %274 }
  0xfe   :  { %v320_v25 = vmul.f32 %v1335_v63, %v275_v59  ;;  %v418_v59 = vmul.f32 %v1349_v11, %v1368_v24 }
  0xff   :  { %670 = vperm.xlu1 %1057, %v608_v47   ;;  %961 = vmatprep.subr.bf16.mxu0 %v594_v42 }
 0x100   :  { %962 = vmatpush3.bf16.msra.mxu0 %v594_v42  ;;  %v336_v33 = vadd.f32 %v320_v25, %v1469_v2  ;;  %v53_v42 = vpop.permute.xlu0 %52 }
 0x102   :  { %v68_v23 = vpop.permute.xlu1 %67 }
 0x103   :  { %660 = vperm.xlu1 %1057, %v606_v18   ;;  %v133_v9 = vmul.f32 %v1337_v0, %v68_v23 }
 0x104   :  { %v489_v40 = vpop.permute.xlu0 %488 }
 0x107   :  { %v163_v34 = vpop.permute.xlu1 %162  ;;  %650 = vperm.xlu1 %1057, %v604_v48  }
 0x108   :  { %v217_v30 = vmul.f32 %v1332_v61, %v163_v34 }
 0x10a   :  { %v233_v57 = vadd.f32 %v217_v30, %v133_v9 }
 0x10b   :  { %v167_v60 = vpop.permute.xlu1 %166  ;;  %640 = vperm.xlu1 %1057, %v602_v50  }
 0x10c   :  { %v218_v45 = vmul.f32 %v1332_v61, %v167_v60 }
 0x10e   :  { %v234_v4 = vadd.f32 %v218_v45, %v134_v32  ;;  %v1063_v32 = vld [vmem:[%s1597_s3 + $0x28] sm:$0xff]   ;;  %v1064_v45 = vld [vmem:[%s1597_s3 + $0x30] sm:$0xff]  }
 0x10f   :  { %630 = vperm.xlu1 %1057, %v600_v22  }
 0x110   :  { %v375_v5 = vpop.permute.xlu1 %374 }
 0x111   :  { %v420_v15 = vmul.f32 %v1349_v11, %v375_v5 }
 0x113   :  { %620 = vperm.xlu1 %1057, %v598_v6   ;;  %v436_v26 = vadd.f32 %v420_v15, %v336_v33 }
 0x115   :  { %v504_v16 = vpop.permute.xlu1 %503 }
 0x116   :  { %v549_v54 = vadd.f32 %v504_v16, %v437_v49  ;;  %v479_v16 = vpop.permute.xlu0 %478 }
 0x118   :  { %v565_v17 = vmax.f32 %v549_v54, 0.0 }
 0x11a   :  { %v593_v62 = vpack.c.bf16 %v566_v12, %v565_v17  ;;  %v263_v27 = vpop.permute.xlu1 %262 }
 0x11b   :  { %v317_v18 = vmul.f32 %v1335_v63, %v263_v27  ;;  %v130_v27 = vmul.f32 %v1337_v0, %v53_v42 }
 0x11c   :  { %963 = vmatprep.subr.bf16.mxu0 %v593_v62 }
 0x11d   :  { %964 = vmatpush3.bf16.msra.mxu0 %v593_v62  ;;  %v333_v52 = vadd.f32 %v317_v18, %v233_v57 }
 0x11e   :  { %v267_v10 = vpop.permute.xlu1 %266 }
 0x11f   :  { %v318_v2 = vmul.f32 %v1335_v63, %v267_v10 }
 0x121   :  { %v334_v47 = vadd.f32 %v318_v2, %v234_v4  ;;  %v1092_v2 = vmov 0.0  }
 0x122   :  { %989 = vmatprep.subr.bf16.mxu1 %v1092_v2  ;;  %1005 = vmatprep.mubr.msk.bf16.mxu1 %vm1093_vm0, %v1092_v2 }
 0x123   :  { %v63_v21 = vpop.permute.xlu1 %62  ;;  %v434_v23 = vadd.f32 %v418_v59, %v334_v47 }
 0x124   :  { %v132_v24 = vmul.f32 %v1337_v0, %v63_v21 }
 0x125   :  { %v546_v55 = vadd.f32 %v489_v40, %v434_v23 }
 0x127   :  { %v562_v56 = vmax.f32 %v546_v55, 0.0 }
 0x128   :  { %v159_v43 = vpop.permute.xlu1 %158 }
 0x129   :  { %v216_v13 = vmul.f32 %v1332_v61, %v159_v43 }
 0x12b   :  { %v232_v3 = vadd.f32 %v216_v13, %v132_v24 }
 0x12d   :  { %v363_v8 = vpop.permute.xlu1 %362 }
 0x12e   :  { %v417_v48 = vmul.f32 %v1349_v11, %v363_v8  ;;  %v413_v8 = vmul.f32 %v1349_v11, %v1379_v31  ;;  %v1060_v31 = vld [vmem:[%s1597_s3 + $0x10] sm:$0xff]  }
 0x130   :  { %v433_v34 = vadd.f32 %v417_v48, %v333_v52  ;;  %v686_v48 = vpop.permute.xlu0 %685 }
 0x132   :  { %v494_v28 = vpop.permute.xlu1 %493 }
 0x133   :  { %v547_v35 = vadd.f32 %v494_v28, %v1440_v58 }
 0x134   :  { %v676_v55 = vpop.permute.xlu0 %675 }
 0x135   :  { %v563_v39 = vmax.f32 %v547_v35, 0.0 }
 0x136   :  { %v499_v36 = vpop.permute.xlu1 %498 }
 0x137   :  { %v548_v20 = vadd.f32 %v499_v36, %v436_v26 }
 0x139   :  { %v564_v41 = vmax.f32 %v548_v20, 0.0 }
 0x13b   :  { %v592_v29 = vpack.c.bf16 %v564_v41, %v563_v39  ;;  %v259_v14 = vpop.permute.xlu1 %258 }
 0x13c   :  { %v316_v22 = vmul.f32 %v1335_v63, %v259_v14  ;;  %v1061_v14 = vld [vmem:[%s1597_s3 + $0x18] sm:$0xff]  }
 0x13d   :  { %965 = vmatprep.subr.bf16.mxu0 %v592_v29 }
 0x13e   :  { %966 = vmatpush3.bf16.msra.mxu0 %v592_v29  ;;  %v332_v38 = vadd.f32 %v316_v22, %v232_v3 }
 0x140   :  { %v48_v44 = vpop.permute.xlu1 %47 }
 0x141   :  { %v129_v19 = vmul.f32 %v1337_v0, %v48_v44  ;;  %v1062_v44 = vld [vmem:[%s1597_s3 + $0x20] sm:$0xff]  }
 0x145   :  { %v147_v46 = vpop.permute.xlu1 %146 }
 0x146   :  { %v213_v5 = vmul.f32 %v1332_v61, %v147_v46  ;;  %v1065_v46 = vld [vmem:[%s1597_s3 + $0x38] sm:$0xff]  }
 0x148   :  { %v229_v54 = vadd.f32 %v213_v5, %v129_v19 }
 0x149   :  { %v151_v58 = vpop.permute.xlu1 %150 }
 0x14a   :  { %v214_v12 = vmul.f32 %v1332_v61, %v151_v58 }
 0x14c   :  { %v230_v25 = vadd.f32 %v214_v12, %v130_v27 }
 0x14e   :  { %v359_v51 = vpop.permute.xlu1 %358 }
 0x14f   :  { %v416_v57 = vmul.f32 %v1349_v11, %v359_v51 }
 0x151   :  { %v432_v6 = vadd.f32 %v416_v57, %v332_v38 }
 0x153   :  { %v484_v9 = vpop.permute.xlu1 %483  ;;  %v544_v17 = vadd.f32 %v479_v16, %v432_v6 }
 0x154   :  { %v545_v30 = vadd.f32 %v484_v9, %v433_v34 }
 0x155   :  { %v560_v33 = vmax.f32 %v544_v17, 0.0 }
 0x156   :  { %v561_v50 = vmax.f32 %v545_v30, 0.0 }
 0x158   :  { %v591_v60 = vpack.c.bf16 %v562_v56, %v561_v50  ;;  %v247_v53 = vpop.permute.xlu1 %246 }
 0x159   :  { %v313_v49 = vmul.f32 %v1335_v63, %v247_v53 }
 0x15a   :  { %967 = vmatprep.subr.bf16.mxu0 %v591_v60 }
 0x15b   :  { %968 = vmatpush3.bf16.msra.mxu0 %v591_v60  ;;  %v329_v10 = vadd.f32 %v313_v49, %v229_v54  ;;  %v666_v60 = vpop.permute.xlu0 %665 }
 0x15c   :  { %v251_v1 = vpop.permute.xlu1 %250 }
 0x15d   :  { %v314_v21 = vmul.f32 %v1335_v63, %v251_v1  ;;  %v429_v36 = vadd.f32 %v413_v8, %v329_v10 }
 0x15f   :  { %v330_v26 = vadd.f32 %v314_v21, %v230_v25  ;;  %v656_v57 = vpop.permute.xlu0 %655 }
 0x161   :  { %v351_v7 = vpop.permute.xlu1 %350 }
 0x162   :  { %v414_v15 = vmul.f32 %v1349_v11, %v351_v7  ;;  %v1059_v11 = vld [vmem:[%s1597_s3 + $0x8] sm:$0xff]  }
 0x163   :  { %v646_v27 = vpop.permute.xlu0 %645 }
 0x164   :  { %v430_v0 = vadd.f32 %v414_v15, %v330_v26 }
 0x166   :  { %v474_v62 = vpop.permute.xlu1 %473 }
 0x167   :  { %v543_v43 = vadd.f32 %v474_v62, %v1458_v37  ;;  %v636_v26 = vpop.permute.xlu0 %635 }
 0x169   :  { %v559_v28 = vmax.f32 %v543_v43, 0.0 }
 0x16a   :  { %v464_v35 = vpop.permute.xlu1 %463 }
 0x16b   :  { %v590_v61 = vpack.c.bf16 %v560_v33, %v559_v28  ;;  %v541_v20 = vadd.f32 %v464_v35, %v429_v36 }
 0x16d   :  { %969 = vmatprep.subr.bf16.mxu0 %v590_v61  ;;  %v557_v41 = vmax.f32 %v541_v20, 0.0 }
 0x16e   :  { %v469_v39 = vpop.permute.xlu1 %468  ;;  %970 = vmatpush3.bf16.msra.mxu0 %v590_v61 }
 0x16f   :  { %v542_v63 = vadd.f32 %v469_v39, %v430_v0 }
 0x171   :  { %v558_v37 = vmax.f32 %v542_v63, 0.0 }
 0x172   :  { %v691_v18 = vpop.permute.xlu1 %690 }
 0x173   :  { %v589_v29 = vpack.c.bf16 %v558_v37, %v557_v41 }
 0x175   :  { %971 = vmatprep.subr.bf16.mxu0 %v589_v29 }
 0x176   :  { %972 = vmatpush3.bf16.msra.mxu0 %v589_v29  ;;  %v681_v40 = vpop.permute.xlu1 %680  ;;  %v626_v29 = vpop.permute.xlu0 %625 }
 0x179   :  { %974 = vmatmul.mubr.bf16.vlgmr.msra.gmra.mxu0 %v1059_v11 }
 0x17a   :  { %977 = vmatprep.mubr.bf16.mxu0 %v1060_v31  ;;  %v671_v50 = vpop.permute.xlu1 %670 }
 0x17e   :  { %v661_v22 = vpop.permute.xlu1 %660 }
 0x181   :  { %978 = vmatmul.mubr.bf16.gmra.mxu0 %v1061_v14 }
 0x182   :  { %981 = vmatprep.mubr.bf16.mxu0 %v1062_v44  ;;  %v651_v12 = vpop.permute.xlu1 %650 }
 0x186   :  { %v641_v15 = vpop.permute.xlu1 %640 }
 0x189   :  { %982 = vmatmul.mubr.bf16.gmra.mxu0 %v1063_v32 }
 0x18a   :  { %985 = vmatprep.mubr.bf16.mxu0 %v1064_v45  ;;  %v631_v63 = vpop.permute.xlu1 %630 }
 0x18e   :  { %v621_v45 = vpop.permute.xlu1 %620 }
 0x191   :  { %986 = vmatmul.mubr.bf16.gmra.mxu0 %v1065_v46 }
 0x239   :  { %v1572_v4 = vpop.f32.mrf.mxu0 }
 0x23a   :  { %v784_v44 = vadd.f32 %v1572_v4, %v626_v29 }
 0x23b   :  { %v1574_v58 = vpop.f32.mrf.mxu0 }
 0x23d   :  { %v976_v47 = vpop.f32.mrf.mxu0 }
 0x23e   :  { %v787_v11 = vadd.f32 %v976_v47, %v631_v63 }
 0x23f   :  { %v1576_v42 = vpop.f32.mrf.mxu0 }
 0x240   :  { %v841_v46 = vmax.f32 %v787_v11, 0.0 }
 0x241   :  { %v979_v59 = vpop.f32.mrf.mxu0 }
 0x242   :  { %v800_v61 = vadd.f32 %v979_v59, %v646_v27  ;;  %v779_v59 = vadd.f32 %v1576_v42, %v621_v45  ;;  %v854_v42 = vld [vmem:[%s1599_s5] sm:$0x1] }
 0x243   :  { %v791_v23 = vpop.f32.mrf.mxu0 }
 0x244   :  { %v844_v41 = vmax.f32 %v800_v61, 0.0  ;;  %v792_v37 = vadd.f32 %v791_v23, %v636_v26  ;;  %v840_v23 = vmax.f32 %v784_v44, 0.0 }
 0x245   :  { %v980_v51 = vpop.f32.mrf.mxu0 }
 0x246   :  { %v803_v28 = vadd.f32 %v980_v51, %v651_v12  ;;  %v842_v32 = vmax.f32 %v792_v37, 0.0  ;;  %v856_v47 = vpack.c.bf16 %v841_v46, %v840_v23 }
 0x247   :  { %v794_v52 = vpop.f32.mrf.mxu0 }
 0x248   :  { %v845_v20 = vmax.f32 %v803_v28, 0.0  ;;  %v795_v0 = vadd.f32 %v794_v52, %v641_v15  ;;  %v839_v52 = vmax.f32 %v779_v59, 0.0 }
 0x249   :  { %v983_v34 = vpop.f32.mrf.mxu0 }
 0x24a   :  { %v816_v17 = vadd.f32 %v983_v34, %v666_v60  ;;  %v858_v31 = vpack.c.bf16 %v845_v20, %v844_v41  ;;  %v843_v14 = vmax.f32 %v795_v0, 0.0 }
 0x24b   :  { %v807_v9 = vpop.f32.mrf.mxu0 }
 0x24c   :  { %v848_v8 = vmax.f32 %v816_v17, 0.0  ;;  %v808_v25 = vadd.f32 %v807_v9, %v656_v57 }
 0x24d   :  { %v984_v30 = vpop.f32.mrf.mxu0 }
 0x24e   :  { %v819_v49 = vadd.f32 %v984_v30, %v671_v50  ;;  %v846_v36 = vmax.f32 %v808_v25, 0.0 }
 0x24f   :  { %v810_v56 = vpop.f32.mrf.mxu0 }
 0x250   :  { %v849_v10 = vmax.f32 %v819_v49, 0.0  ;;  %v811_v21 = vadd.f32 %v810_v56, %v661_v22 }
 0x251   :  { %v987_v53 = vpop.f32.mrf.mxu0 }
 0x252   :  { %v832_v24 = vadd.f32 %v987_v53, %v686_v48  ;;  %v860_v33 = vpack.c.bf16 %v849_v10, %v848_v8  ;;  %v847_v35 = vmax.f32 %v811_v21, 0.0  ;;  %v616_v48 = vpop.permute.xlu0 %615 }
 0x253   :  { %v823_v13 = vpop.f32.mrf.mxu0  ;;  %v776_v51 = vadd.f32 %v1574_v58, %v616_v48 }
 0x254   :  { %v852_v5 = vmax.f32 %v832_v24, 0.0  ;;  %v824_v6 = vadd.f32 %v823_v13, %v676_v55  ;;  %v859_v39 = vpack.c.bf16 %v847_v35, %v846_v36 }
 0x255   :  { %v988_v1 = vpop.f32.mrf.mxu0 }
 0x256   :  { %v835_v3 = vadd.f32 %v988_v1, %v691_v18  ;;  %v850_v62 = vmax.f32 %v824_v6, 0.0  ;;  %v857_v18 = vpack.c.bf16 %v843_v14, %v842_v32  ;;  %v867_v34 = vpop.permute.xlu0 %866 }
 0x257   :  { %v826_v38 = vpop.f32.mrf.mxu0 }
 0x258   :  { %v853_v7 = vmax.f32 %v835_v3, 0.0  ;;  %v827_v19 = vadd.f32 %v826_v38, %v681_v40  ;;  %v838_v40 = vmax.f32 %v776_v51, 0.0 }
 0x25a   :  { %v851_v16 = vmax.f32 %v827_v19, 0.0  ;;  %v862_v54 = vpack.c.bf16 %v853_v7, %v852_v5  ;;  %v855_v4 = vpack.c.bf16 %v839_v52, %v838_v40 }
 0x25c   :  { %990 = vmatpush3.bf16.msra.mxu1 %v862_v54  ;;  %v861_v43 = vpack.c.bf16 %v851_v16, %v850_v62 }
 0x25d   :  { %991 = vmatprep.subr.bf16.mxu1 %v1092_v2 }
 0x260   :  { %992 = vmatpush3.bf16.msra.mxu1 %v861_v43 }
 0x261   :  { %993 = vmatprep.subr.bf16.mxu1 %v1092_v2 }
 0x264   :  { %994 = vmatpush3.bf16.msra.mxu1 %v860_v33 }
 0x265   :  { %995 = vmatprep.subr.bf16.mxu1 %v1092_v2 }
 0x268   :  { %996 = vmatpush3.bf16.msra.mxu1 %v859_v39 }
 0x269   :  { %997 = vmatprep.subr.bf16.mxu1 %v1092_v2 }
 0x26c   :  { %998 = vmatpush3.bf16.msra.mxu1 %v858_v31 }
 0x26d   :  { %999 = vmatprep.subr.bf16.mxu1 %v1092_v2 }
 0x270   :  { %1000 = vmatpush3.bf16.msra.mxu1 %v857_v18 }
 0x271   :  { %1001 = vmatprep.subr.bf16.mxu1 %v1092_v2 }
 0x274   :  { %1002 = vmatpush3.bf16.msra.mxu1 %v856_v47 }
 0x275   :  { %1003 = vmatprep.subr.bf16.mxu1 %v1092_v2 }
 0x278   :  { %1004 = vmatpush3.bf16.msra.mxu1 %v855_v4 }
 0x27b   :  { %1006 = vmatmul.mubr.bf16.vlgmr.msra.gmra.mxu1 %v854_v42 }
 0x33b   :  { %v903_v58 = vpop.f32.mrf.mxu1 }
 0x33c   :  { %v904_v55 = vadd.f32 %v903_v58, %v867_v34 }
 0x33d   :  { %v1007_v9 = vpop.f32.mrf.mxu1 }
 0x33e   :  { %909 = vst [vmem:[#allocation2] sm:$0x3] %v904_v55 }
 0x33f   :  { %v906_v30 = vpop.f32.mrf.mxu1 }
 0x340   :  { %1077 = shalt.err (!%p1074_p4)
}
 0x341   :  { %919 = dma.vmem_to_hbm [thread:$0]  %s917_s18, 32, %s1601_s7, [#allocation3]   ;;  %v1008_v2 = vpop.f32.mrf.mxu1 }
 0x342   :  { %1086 = dma.done.wait [#allocation3], 32  }
 0x343   :  { %1087 = vsyncadd [#allocation3], 4294967264 }
 0x344   :  { %923 = vsyncpa [#allocation3], 1 }

</bundles_post_ra>
